<compile_context>
chip_gen: v7x
topology: tpu7x:2x2x1
jax: 0.10.0
libtpu: 0.0.40
codegen_flags: <defaults>
</compile_context>

<pallas_src>
import math

import jax
import jax.numpy as jnp
from jax.experimental import pallas as pl
from jax.experimental.pallas import tpu as pltpu


def attribute_gate_kernel(lb_ref, r_ref, o_ref):
    # lb_ref: (RT, O) left-projection rows for this tile, bias folded in (compute dtype).
    # r_ref : (CT, O) right-projection rows for this tile (compute dtype).
    # o_ref : (RT, CT, O) output tile.
    lb = lb_ref[...]
    r = r_ref[...]
    g = lb[:, None, :] + r[None, :, :]            # (RT, CT, O): one VPU add / element
    # TODO(synk): training-mode dropout (pltpu.prng_seed / prng_random_bits) omitted;
    # eval-mode F.dropout is identity.
    o_ref[...] = jnp.tanh(g).astype(o_ref.dtype)  # tanh on the EUP, cast at the store


def _vmem_capacity_bytes():
    try:
        return int(pltpu.get_tpu_info().vmem_capacity_bytes)
    except Exception:
        return 64 * 2**20  # v7x per-core VMEM: smallest across v5e / v6e / v7x


def _supports_bf16_vector_math():
    """bf16 VPU/EUP exists on v6e / v7x; v5e and older do not (keep f32 math there)."""
    try:
        kind = jax.devices()[0].device_kind.lower()
    except Exception:
        return False
    return not any(tag in kind for tag in ("v2", "v3", "v4", "v5"))


def _aligned_divisors(n):
    """Divisors of n that are multiples of 8, plus n itself (full dim), descending.
    Guarantees every tile satisfies the (8, 128) sublane rule."""
    divs = [d for d in range(1, n + 1) if n % d == 0]
    aligned = sorted({d for d in divs if d % 8 == 0 or d == n}, reverse=True)
    return aligned


def _choose_tiles(n, o_pad, out_bytes, compute_bytes, budget_bytes,
                  target_block_bytes=8 * 2**20):
    """Pick (row_tile, col_tile): sublane-aligned, output block in the ~4-16 MiB
    sweet spot, grid >= 4 steps preferred (pipelining + v7x two TCs), all VMEM
    users (incl. the in-kernel broadcast/tanh temporaries) within budget."""
    row_divs = _aligned_divisors(n)
    col_divs = _aligned_divisors(n)

    def vmem_use(rt, ct):
        out_blk = 2 * rt * ct * o_pad * out_bytes          # double-buffered output
        tmp_blk = 2 * rt * ct * o_pad * compute_bytes      # broadcast-add / tanh temporaries
        lb_blk = 2 * rt * o_pad * compute_bytes
        # TODO(synk): r could be single-buffered (pipeline_mode=pl.Buffered(1), its
        # index_map is constant along the row axis); kept at the default double
        # buffering for lowering robustness and charged 2x here.
        r_blk = 2 * ct * o_pad * compute_bytes
        return out_blk + tmp_blk + lb_blk + r_blk

    def out_block_bytes(rt, ct):
        return rt * ct * o_pad * out_bytes

    def pick(cap):
        # Prefer full-width column blocks (contiguous output DMA) first.
        for ct in col_divs:
            fitting = [rt for rt in row_divs
                       if vmem_use(rt, ct) <= budget_bytes
                       and out_block_bytes(rt, ct) <= cap]
            if not fitting:
                continue
            for min_steps in (4, 2, 1):
                pool = [rt for rt in fitting if (n // rt) * (n // ct) >= min_steps]
                if pool:
                    return pool[0], ct   # largest row tile meeting the step preference
        return None

    choice = pick(min(target_block_bytes, budget_bytes)) or pick(budget_bytes)
    if choice is None:
        choice = (row_divs[-1], col_divs[-1])  # smallest aligned tiles (pathological N)
    return choice


def attribute_gate(h, W, b, *, out_dtype=jnp.float32, compute_dtype=None,
                   row_tile=None, col_tile=None, vmem_budget_bytes=None):
    """Pallas implementation of AttributeGate.forward (eval mode).

    out_dtype=jnp.bfloat16 roughly halves HBM-write traffic (the roofline);
    tanh output is in [-1, 1] so bf16 is well-conditioned.
    """
    N, F = h.shape
    two_f, O = W.shape
    assert two_f == 2 * F
    out_dtype = jnp.dtype(out_dtype)

    # Hoisted (tiny) projections in f32; bias folded into the left term so the
    # kernel does a single broadcast-add + tanh per output element.
    h32 = h.astype(jnp.float32)
    lb = h32 @ W[:F, :].astype(jnp.float32) + b.astype(jnp.float32)
    r = h32 @ W[F:, :].astype(jnp.float32)

    # Compute dtype: bf16 add+tanh only when the output is 16-bit AND the chip
    # has a bf16 VPU/EUP (v6e / v7x); otherwise f32 math with cast-at-store.
    if compute_dtype is None:
        if out_dtype.itemsize <= 2 and _supports_bf16_vector_math():
            compute_dtype = jnp.bfloat16
        else:
            compute_dtype = jnp.float32
    compute_dtype = jnp.dtype(compute_dtype)

    # Pad the feature axis to a multiple of 128 lanes so all stores are
    # lane-dense (unmasked vst); the pad is sliced off after the call.
    o_pad = ((O + 127) // 128) * 128
    if o_pad != O:
        pad = ((0, 0), (0, o_pad - O))
        lb = jnp.pad(lb, pad)
        r = jnp.pad(r, pad)
    lb = lb.astype(compute_dtype)
    r = r.astype(compute_dtype)

    vmem_cap = _vmem_capacity_bytes()
    if vmem_budget_bytes is None:
        vmem_budget_bytes = vmem_cap // 2  # headroom for compiler scratch
    rt_auto, ct_auto = _choose_tiles(N, o_pad, out_dtype.itemsize,
                                     compute_dtype.itemsize, vmem_budget_bytes)
    row_tile = rt_auto if row_tile is None else row_tile
    col_tile = ct_auto if col_tile is None else col_tile
    assert N % row_tile == 0 and N % col_tile == 0
    grid = (N // row_tile, N // col_tile)

    cost = pl.CostEstimate(
        flops=N * N * o_pad,                 # one add per output element
        transcendentals=N * N * o_pad,       # one tanh per output element
        bytes_accessed=N * N * o_pad * out_dtype.itemsize
        + 2 * N * o_pad * compute_dtype.itemsize,
    )

    out = pl.pallas_call(
        attribute_gate_kernel,
        out_shape=jax.ShapeDtypeStruct((N, N, o_pad), out_dtype),
        grid_spec=pltpu.PrefetchScalarGridSpec(
            num_scalar_prefetch=0,
            grid=grid,
            in_specs=[
                pl.BlockSpec((row_tile, o_pad), lambda i, j: (i, 0)),  # left term + bias
                pl.BlockSpec((col_tile, o_pad), lambda i, j: (j, 0)),  # right term
            ],
            out_specs=pl.BlockSpec((row_tile, col_tile, o_pad),
                                   lambda i, j: (i, j, 0)),
        ),
        compiler_params=pltpu.CompilerParams(
            dimension_semantics=("parallel", "parallel"),
            vmem_limit_bytes=int(vmem_cap * 3 // 4),
        ),
        cost_estimate=cost,
    )(lb, r)

    if o_pad != O:
        out = out[:, :, :O]
    return out


def xavier_uniform(key, shape):
    # nn.init.xavier_uniform_ for a 2D tensor: U(-a, a), a = sqrt(6/(fan_in+fan_out))
    fan_in, fan_out = shape
    bound = math.sqrt(6.0 / (fan_in + fan_out))
    return jax.random.uniform(key, shape, jnp.float32, -bound, bound)


if __name__ == "__main__":
    key = jax.random.PRNGKey(0)
    k_h, k_w, k_b = jax.random.split(key, 3)

    # Small demo shapes; out_features = 128 keeps the output lane-dense natively.
    N, in_features, out_features = 16, 32, 128
    dropout = 0.1  # unused at inference (identity)

    h = jax.random.normal(k_h, (N, in_features), jnp.float32)
    W = xavier_uniform(k_w, (2 * in_features, out_features))
    b = xavier_uniform(k_b, (1, out_features))

    # Pure-JAX reference of the PyTorch forward (eval mode).
    l_ref = h @ W[:in_features, :]
    r_ref = h @ W[in_features:, :]
    ref = jnp.tanh(l_ref[:, None, :] + r_ref[None, :, :] + b)

    # 1) f32 output path (matches the module's dtype exactly).
    out_f32 = jax.block_until_ready(attribute_gate(h, W, b, out_dtype=jnp.float32))
    assert out_f32.shape == (N, N, out_features)
    assert jnp.allclose(out_f32, ref, atol=1e-5, rtol=1e-5)

    # 2) bf16 output path (halves the HBM-write roofline; tanh output is in [-1, 1]).
    out_bf16 = jax.block_until_ready(attribute_gate(h, W, b, out_dtype=jnp.bfloat16))
    assert out_bf16.dtype == jnp.bfloat16
    assert jnp.allclose(out_bf16.astype(jnp.float32), ref, atol=3e-2, rtol=3e-2)

    # 3) Non-128-multiple out_features exercises the lane-padding path.
    O2 = 72
    W2 = xavier_uniform(k_w, (2 * in_features, O2))
    b2 = xavier_uniform(k_b, (1, O2))
    ref2 = jnp.tanh((h @ W2[:in_features, :])[:, None, :]
                    + (h @ W2[in_features:, :])[None, :, :] + b2)
    out2 = jax.block_until_ready(attribute_gate(h, W2, b2))
    assert out2.shape == (N, N, O2)
    assert jnp.allclose(out2, ref2, atol=1e-5, rtol=1e-5)

    print("KERNEL_OK")
</pallas_src>

<mosaic_0001>
module attributes {stable_mosaic.version = 11 : i64} {
  func.func @attribute_gate_kernel(%arg0: i32, %arg1: i32, %arg2: memref<8x128xf32, #tpu.memory_space<vmem>>, %arg3: memref<16x128xf32, #tpu.memory_space<vmem>>, %arg4: memref<8x16x128xf32, #tpu.memory_space<vmem>>) attributes {dimension_semantics = [#tpu.dimension_semantics<parallel>, #tpu.dimension_semantics<parallel>], iteration_bounds = array<i64: 2, 1>, scalar_prefetch = 0 : i64, scratch_operands = 0 : i64, tpu.core_type = #tpu.core_type<tc>, window_params = [{transform_indices = @transform_0, window_bounds = array<i64: 8, 128>}, {transform_indices = @transform_1, window_bounds = array<i64: 16, 128>}, {transform_indices = @transform_2, window_bounds = array<i64: 8, 16, 128>}]} {
    %c0 = arith.constant 0 : index
    %c0_0 = arith.constant 0 : index
    %0 = vector.load %arg2[%c0, %c0_0] : memref<8x128xf32, #tpu.memory_space<vmem>>, vector<8x128xf32>
    %c0_1 = arith.constant 0 : index
    %c0_2 = arith.constant 0 : index
    %1 = vector.load %arg3[%c0_1, %c0_2] : memref<16x128xf32, #tpu.memory_space<vmem>>, vector<16x128xf32>
    %2 = vector.shape_cast %0 : vector<8x128xf32> to vector<8x1x128xf32>
    %3 = vector.shape_cast %1 : vector<16x128xf32> to vector<1x16x128xf32>
    %4 = vector.broadcast %2 : vector<8x1x128xf32> to vector<8x16x128xf32>
    %5 = vector.broadcast %3 : vector<1x16x128xf32> to vector<8x16x128xf32>
    %6 = arith.addf %4, %5 : vector<8x16x128xf32>
    %7 = math.tanh %6 : vector<8x16x128xf32>
    %c0_3 = arith.constant 0 : index
    %c0_4 = arith.constant 0 : index
    %c0_5 = arith.constant 0 : index
    %8 = vector.load %arg4[%c0_3, %c0_4, %c0_5] : memref<8x16x128xf32, #tpu.memory_space<vmem>>, vector<8x16x128xf32>
    tpu.vector_store %arg4[%c0_3, %c0_4, %c0_5], %7 {strides = array<i32>} : memref<8x16x128xf32, #tpu.memory_space<vmem>>, vector<8x16x128xf32>,
    return
  }
  func.func @transform_0(%arg0: i32, %arg1: i32) -> (i32, i32) {
    %c0_i32 = arith.constant 0 : i32
    %c0_i32_0 = arith.constant 0 : i32
    return %arg0, %c0_i32 : i32, i32
  }
  func.func @transform_1(%arg0: i32, %arg1: i32) -> (i32, i32) {
    %c0_i32 = arith.constant 0 : i32
    %c0_i32_0 = arith.constant 0 : i32
    return %arg1, %c0_i32 : i32, i32
  }
  func.func @transform_2(%arg0: i32, %arg1: i32) -> (i32, i32, i32) {
    %c0_i32 = arith.constant 0 : i32
    %c0_i32_0 = arith.constant 0 : i32
    return %arg0, %arg1, %c0_i32 : i32, i32, i32
  }
}

</mosaic_0001>

<bundles_post_ra>
// kernel: tpu_custom_call.1
= control target key start
LH: loop header
LB: loop body
LE: loop exit
PB: predicated region body
PF: predicated region fallthrough
CT: control target
= control target key end

     0   :  { %7 = vsyncpa [#allocation3], 0  ;;  %s988_s0 = inlined_call_operand.hbm [shape: f32[16,128], index: 0, kind: input, shape index: {}]   ;;  %s989_s1 = inlined_call_operand.hbm [shape: f32[16,128], index: 1, kind: input, shape index: {}]   ;;  %s990_s2 = inlined_call_operand.hbm [shape: f32[16,16,128], index: 2, kind: output, shape index: {}]  }
   0x1   :  { %9 = vsyncpa [#allocation3 + $0x1], 0 }
   0x2   :  { %10 = vsyncpa [#allocation6], 0 }
   0x3   :  { %11 = vsyncpa [#allocation4], 0 }
   0x4   :  { %13 = vsyncpa [#allocation4 + $0x1], 0  ;;  %s752_s9 = smov 0   ;;  %s754_s10 = smov 0  }
   0x5   :  { %s756_s11 = smov 0   ;;  %s758_s12 = smov 0  }
   0x6   :  { %s760_s13 = smov 0   ;;  %s762_s14 = smov 0  }
   0x7 LB: > { %s453_s15 = sadd.s32 4294967295, %s727_s14   ;;  %s454_s16 = sadd.s32 4294967294, %s727_s14   ;;  %s727_s14 = sphi %s762_s14, %s19_s14   ;;  %s723_s13 = sphi %s760_s13, %s1014_s13   ;;  %s719_s12 = sphi %s758_s12, %s1013_s12   ;;  %s715_s11 = sphi %s756_s11, %s1012_s11   ;;  %s711_s10 = sphi %s754_s10, %s1011_s10   ;;  %s707_s9 = sphi %s752_s9, %s1010_s9  }
   0x8   : > { %p51_p0 = scmp.ne.s32.totalorder %s711_s10, %s707_s9  ;;  %p786_p1 = scmp.eq.s32.totalorder %s453_s15, 0 }
   0x9   : > { %p790_p2 = scmp.eq.s32.totalorder %s453_s15, 1  ;;  %p109_p3 = scmp.eq.s32.totalorder %s454_s16, 1 }
   0xa   : > { %s995_s17 = scalar_select %p786_p1, 1, 0 }
   0xb   : > { %s996_s18 = scalar_select %p790_p2, 1, 0 }
   0xc   : > { %p796_p4 = por %p786_p1, %p51_p0  ;;  %p455_p5 = scmp.ge.s32.totalorder %s727_s14, 1 }
   0xd   : > { %p801_p6 = por %p109_p3, %p51_p0  ;;  %p116_p7 = scmp.lt.s32.totalorder %s727_s14, 3 }
   0xe   : > { %s997_s19 = scalar_select %p796_p4, 1, 0 }
   0xf   : > { %s998_s20 = scalar_select %p801_p6, 1, 0 }
  0x10   : > { %p806_p8 = pnand %p455_p5, %p116_p7  ;;  %s729_s22 = smov [#allocation5]  }
  0x11   : > { %s131_s23 = sshll.u32 %s729_s22, 4  ;;  %s31_s25 = sadd.s32 1, %s723_s13  ;;  %s132_s23 = int_to_ptr.vmem [resolvable:$true] %s131_s23 }
  0x12   : > { %s999_s21 = scalar_select %p806_p8, 1, 0 }
  0x13   : > { %p480_p9 = pneg %p806_p8  ;;  %s583_s28 = scalar_lea.hbm %s989_s1, 256 }
  0x14   : > { %p584_p12 = scmp.ne.s32.totalorder %s989_s1, %s583_s28  ;;  %p590_p5 = scmp.lt.u32.totalorder %s583_s28, %s989_s1 }
  0x15   : > { %p815_p11 = pnand %p480_p9, %p786_p1 }
  0x17   : > { %p585_p13 = pneg %p815_p11 }
  0x19   : > { %p586_p0 = pnand %p585_p13, %p584_p12 }
  0x1b   : > { %p587_p3 = pneg %p586_p0 }
  0x1d   : > { %p592_p7 = pnand %p590_p5, %p587_p3 }
  0x1f   : > { %595 = shalt.err (!%p592_p7)
}
  0x20   : > { %s596_s5 = scalar_lea.vmem %s132_s23, 256  ;;  %p604_p1 = scmp.lt.s32.totalorder %s132_s23, %s132_s23 }
  0x21   : > { %p597_p9 = scmp.ne.s32.totalorder %s132_s23, %s596_s5  ;;  %p605_p4 = scmp.lt.s32.totalorder %s596_s5, %s596_s5 }
  0x23   : > { %p599_p10 = pnand %p597_p9, %p585_p13  ;;  %p606_p8 = por %p605_p4, %p604_p1 }
  0x25   : > { %p600_p6 = pneg %p599_p10 }
  0x27   : > { %p607_p2 = pnand %p606_p8, %p600_p6 }
  0x29   : > { %610 = shalt.err (!%p607_p2)
}
  0x2a   : > { %s730_s6 = smov 128   ;;  %s731_s7 = smov 8  }
  0x2b   : > { %483 = dma.hbm_to_vmem [thread:$0]  (!%p815_p11), %s989_s1, 256, %s132_s23, [#allocation6], %s730_s6, %s730_s6, %s731_s7  }
  0x2c   : > { %p33_p1 = scmp.ge.s32.totalorder %s31_s25, 2  ;;  %s38_s16 = sadd.s32 1, %s715_s11 }
  0x2d   : > { %p45_p2 = scmp.ne.s32.totalorder %s715_s11, %s711_s10  ;;  %p46_p4 = scmp.eq.s32.totalorder %s727_s14, 0 }
  0x2e   : > { %s1016_s25 = smov (%p33_p1, %s31_s25), 0  ;;  %p1002_p8 = scmp.ne.s32.totalorder %s996_s18, 0 }
  0x2f   : > { %p842_p6 = por %p46_p4, %p45_p2  ;;  %s35_s24 = ssub.s32 %s723_s13, %s1016_s25 }
  0x30   : > { %p848_p10 = por %p1002_p8, %p45_p2  ;;  %p493_p12 = scmp.lt.s32.totalorder %s727_s14, 2 }
  0x31   : > { %p36_p11 = scmp.eq.s32.totalorder %s35_s24, 0  ;;  %s145_s23 = sand.u32 1, %s715_s11  }
  0x32   : > { %s458_s27 = sshll.u32 %s145_s23, 3  ;;  %s459_s29 = sshll.u32 %s723_s13, 7 }
  0x33   : > { %s857_s28 = scalar_select %p36_p11, %s715_s11, %s38_s16  }
  0x34   : > { %s863_s4 = scalar_lea.hbm %s988_s0, %s459_s29  ;;  %s149_s18 = scalar_lea.vmem [#allocation2], %s458_s27 }
  0x35   : > { %s156_s5 = sshll.u32 %s149_s18, 4  ;;  %p869_p13 = pnand %p493_p12, %p842_p6  ;;  %s865_s5 = int_to_ptr.vmem [resolvable:$true] %s156_s5 }
  0x36   : > { %s146_s7 = scalar_lea.sflag [#allocation3], %s145_s23  ;;  %s611_s8 = scalar_lea.hbm %s863_s4, 128 }
  0x37   : > { %p612_p0 = scmp.ne.s32.totalorder %s863_s4, %s611_s8  ;;  %p613_p3 = pneg %p869_p13 }
  0x38   : > { %s616_s24 = scalar_lea.hbm %s988_s0, 256  ;;  %p617_p9 = scmp.lt.u32.totalorder %s863_s4, %s988_s0 }
  0x39   : > { %p614_p5 = pnand %p613_p3, %p612_p0  ;;  %p618_p1 = scmp.lt.u32.totalorder %s616_s24, %s611_s8 }
  0x3a   : > { %p620_p4 = scmp.lt.u32.totalorder %s611_s8, %s863_s4 }
  0x3b   : > { %p615_p7 = pneg %p614_p5  ;;  %p619_p2 = por %p618_p1, %p617_p9 }
  0x3d   : > { %p621_p6 = por %p620_p4, %p619_p2 }
  0x3f   : > { %p622_p8 = pnand %p621_p6, %p615_p7 }
  0x41   : > { %625 = shalt.err (!%p622_p8)
}
  0x42   : > { %s626_s23 = scalar_lea.vmem %s865_s5, 128  ;;  %s732_s29 = smov [#allocation2]  }
  0x43   : > { %p627_p12 = scmp.ne.s32.totalorder %s865_s5, %s626_s23  ;;  %s631_s30 = sshll.u32 %s732_s29, 4  ;;  %s632_s30 = int_to_ptr.vmem [resolvable:$false] %s631_s30 }
  0x44   : > { %s633_s3 = scalar_lea.vmem %s632_s30, 256  ;;  %p634_p5 = scmp.lt.s32.totalorder %s865_s5, %s632_s30 }
  0x45   : > { %p629_p11 = pnand %p627_p12, %p613_p3  ;;  %p635_p9 = scmp.lt.s32.totalorder %s633_s3, %s626_s23 }
  0x47   : > { %p630_p0 = pneg %p629_p11  ;;  %p636_p1 = por %p635_p9, %p634_p5 }
  0x49   : > { %p637_p2 = pnand %p636_p1, %p630_p0 }
  0x4b   : > { %640 = shalt.err (!%p637_p2)
}
  0x4c   : > { %487 = dma.hbm_to_vmem [thread:$0]  (!%p869_p13), %s863_s4, 128, %s865_s5, %s146_s7  }
  0x4d   : > { %p1005_p7 = scmp.ne.s32.totalorder %s999_s21, 0 }
  0x4e   : > { %s901_s18 = sand.u32 (!%p1005_p7), 1, %s711_s10   ;;  %p1006_p3 = scmp.ne.s32.totalorder (!%p1005_p7), %s997_s19, 0 }
  0x4f   : > { %165 = sbr.rel (%p1005_p7) target bundleno = 146 (0x92), region = 28  ;;  %s461_s8 = sshll.u32 (!%p1005_p7), %s901_s18, 3 }
  0x50   : > { %s168_s15 = scalar_lea.sflag (!%p1005_p7), [#allocation3], %s901_s18  ;;  %s171_s16 = scalar_lea.vmem (!%p1005_p7), [#allocation2], %s461_s8 }
  0x56   : > { %694 = dma.done.wait (%p1006_p3), %s168_s15, 128  }
  0x57   : > { %696 = vsyncadd (%p1006_p3), %s168_s15, 4294967168  ;;  %p1007_p4 = scmp.ne.s32.totalorder %s995_s17, 0 }
  0x59   : > { %698 = dma.done.wait (%p1007_p4), [#allocation6], 256  }
  0x5a   : > { %700 = vsyncadd (%p1007_p4), [#allocation6], 4294967040  ;;  %v207_v0 = vlaneseq  ;;  %v733_v1 = vmov 1966171168   ;;  %v199_v6 = vld [vmem:[%s171_s16] sm:$0xff]  ;;  %v200_v13 = vld [vmem:[#allocation5] sm:$0xff] }
  0x5b   : > { %v205_v2 = vunpack.c.l.s4 %v733_v1  ;;  %v203_v9 = vcombine.high %v199_v6, %v199_v6  ;;  %v201_v14 = vld [vmem:[#allocation5 + $0x8] sm:$0xff]  ;;  %s463_s17 = sshll.u32 %s901_s18, 7  ;;  %s471_s21 = sshll.u32 %s719_s12, 11 }
  0x5c   : > { %v208_v3 = vshrl.u32 %v207_v0, 7  ;;  %s914_s19 = scalar_lea.vmem [#allocation7], %s463_s17  ;;  %s934_s7 = scalar_lea.hbm %s990_s2, %s471_s21 }
  0x5d   : > { %v206_v4 = vunpack.c.0.s8 %v205_v2  ;;  %s357_s4 = sshll.u32 %s914_s19, 4  ;;  %s341_s12 = scalar_lea.sflag [#allocation4], %s901_s18  ;;  %s936_s4 = int_to_ptr.vmem [resolvable:$true] %s357_s4 }
  0x5e   : > { %v254_v8 = vsub.s32 0, %v208_v3  ;;  %s641_s24 = scalar_lea.vmem %s936_s4, 2048  ;;  %s734_s22 = smov [#allocation7]  }
  0x5f   : > { %v209_v5 = vsub.s32 %v206_v4, %v208_v3  ;;  %p642_p13 = scmp.ne.s32.totalorder %s936_s4, %s641_s24  ;;  %s645_s27 = sshll.u32 %s734_s22, 4  ;;  %s646_s27 = int_to_ptr.vmem [resolvable:$false] %s645_s27 }
  0x60   : > { %s647_s23 = scalar_lea.vmem %s646_s27, 4096  ;;  %p648_p12 = scmp.lt.s32.totalorder %s936_s4, %s646_s27 }
  0x61   : > { %v210_v7 = vrot.slane %v199_v6, %v209_v5  ;;  %v217_v12 = vrot.slane %v203_v9, %v209_v5  ;;  %p643_p6 = pnand %p642_p13, %p848_p10  ;;  %p649_p11 = scmp.lt.s32.totalorder %s647_s23, %s641_s24 }
  0x63   : > { %v226_v10 = vrot.slane %v210_v7, %v209_v5  ;;  %v218_v11 = vcombine.high %v210_v7, %v210_v7  ;;  %v233_v18 = vrot.slane %v217_v12, %v209_v5  ;;  %v219_v19 = vcombine.high %v217_v12, %v217_v12  ;;  %p644_p8 = pneg %p643_p6  ;;  %p650_p0 = por %p649_p11, %p648_p12 }
  0x65   : > { %v255_v15 = vrot.slane %v226_v10, %v254_v8  ;;  %v240_v16 = vrot.slane %v218_v11, %v209_v5  ;;  %v248_v17 = vcombine.high %v226_v10, %v226_v10  ;;  %v271_v25 = vrot.slane %v233_v18, %v254_v8  ;;  %p651_p5 = pnand %p650_p0, %p644_p8 }
  0x66   : > { %v247_v26 = vrot.slane %v219_v19, %v209_v5  ;;  %v249_v27 = vcombine.high %v233_v18, %v233_v18 }
  0x67   : > { %v292_v20 = vadd.f32 %v255_v15, %v200_v13  ;;  %v293_v21 = vadd.f32 %v255_v15, %v201_v14  ;;  %v259_v22 = vrot.slane %v240_v16, %v254_v8  ;;  %v263_v23 = vrot.slane %v248_v17, %v254_v8 }
  0x68   : > { %v250_v24 = vcombine.high %v240_v16, %v240_v16  ;;  %v275_v33 = vrot.slane %v247_v26, %v254_v8  ;;  %v251_v36 = vcombine.high %v247_v26, %v247_v26  ;;  %v300_v37 = vadd.f32 %v271_v25, %v200_v13 }
  0x69   : > { %551 = vtanh.f32 %v292_v20  ;;  %v294_v28 = vadd.f32 %v259_v22, %v200_v13  ;;  %v295_v29 = vadd.f32 %v259_v22, %v201_v14  ;;  %v296_v30 = vadd.f32 %v263_v23, %v200_v13 }
  0x6a   : > { %553 = vtanh.f32 %v293_v21  ;;  %v297_v31 = vadd.f32 %v263_v23, %v201_v14  ;;  %v267_v32 = vrot.slane %v250_v24, %v254_v8  ;;  %v279_v38 = vrot.slane %v249_v27, %v254_v8 }
  0x6b   : > { %555 = vtanh.f32 %v294_v28  ;;  %v301_v39 = vadd.f32 %v271_v25, %v201_v14  ;;  %v302_v40 = vadd.f32 %v275_v33, %v200_v13  ;;  %v283_v41 = vrot.slane %v251_v36, %v254_v8 }
  0x6c   : > { %557 = vtanh.f32 %v295_v29  ;;  %v298_v34 = vadd.f32 %v267_v32, %v200_v13  ;;  %v299_v35 = vadd.f32 %v267_v32, %v201_v14  ;;  %v303_v42 = vadd.f32 %v275_v33, %v201_v14 }
  0x6d   : > { %559 = vtanh.f32 %v296_v30  ;;  %v304_v43 = vadd.f32 %v279_v38, %v200_v13  ;;  %v305_v44 = vadd.f32 %v279_v38, %v201_v14  ;;  %v306_v46 = vadd.f32 %v283_v41, %v200_v13 }
  0x6e   : > { %561 = vtanh.f32 %v297_v31  ;;  %v307_v48 = vadd.f32 %v283_v41, %v201_v14 }
  0x6f   : > { %563 = vtanh.f32 %v298_v34 }
  0x70   : > { %565 = vtanh.f32 %v299_v35 }
  0x71   : > { %567 = vtanh.f32 %v300_v37 }
  0x72   : > { %569 = vtanh.f32 %v301_v39 }
  0x73   : > { %v552_v45 = vpop.eup %551  ;;  %571 = vtanh.f32 %v302_v40 }
  0x74   : > { %v554_v47 = vpop.eup %553  ;;  %324 = vst [vmem:[%s914_s19] sm:$0xff] %v552_v45  ;;  %573 = vtanh.f32 %v303_v42 }
  0x75   : > { %v556_v49 = vpop.eup %555  ;;  %325 = vst [vmem:[%s914_s19 + $0x8] sm:$0xff] %v554_v47  ;;  %575 = vtanh.f32 %v304_v43 }
  0x76   : > { %v558_v50 = vpop.eup %557  ;;  %326 = vst [vmem:[%s914_s19 + $0x10] sm:$0xff] %v556_v49  ;;  %577 = vtanh.f32 %v305_v44 }
  0x77   : > { %v560_v51 = vpop.eup %559  ;;  %327 = vst [vmem:[%s914_s19 + $0x18] sm:$0xff] %v558_v50  ;;  %579 = vtanh.f32 %v306_v46 }
  0x78   : > { %v562_v52 = vpop.eup %561  ;;  %328 = vst [vmem:[%s914_s19 + $0x20] sm:$0xff] %v560_v51  ;;  %581 = vtanh.f32 %v307_v48 }
  0x79   : > { %v564_v53 = vpop.eup %563  ;;  %329 = vst [vmem:[%s914_s19 + $0x28] sm:$0xff] %v562_v52 }
  0x7a   : > { %v566_v54 = vpop.eup %565  ;;  %330 = vst [vmem:[%s914_s19 + $0x30] sm:$0xff] %v564_v53 }
  0x7b   : > { %v568_v55 = vpop.eup %567  ;;  %331 = vst [vmem:[%s914_s19 + $0x38] sm:$0xff] %v566_v54 }
  0x7c   : > { %v570_v56 = vpop.eup %569  ;;  %332 = vst [vmem:[%s914_s19 + $0x40] sm:$0xff] %v568_v55 }
  0x7d   : > { %v572_v57 = vpop.eup %571  ;;  %333 = vst [vmem:[%s914_s19 + $0x48] sm:$0xff] %v570_v56 }
  0x7e   : > { %v574_v58 = vpop.eup %573  ;;  %334 = vst [vmem:[%s914_s19 + $0x50] sm:$0xff] %v572_v57 }
  0x7f   : > { %v576_v59 = vpop.eup %575  ;;  %335 = vst [vmem:[%s914_s19 + $0x58] sm:$0xff] %v574_v58 }
  0x80   : > { %v578_v60 = vpop.eup %577  ;;  %336 = vst [vmem:[%s914_s19 + $0x60] sm:$0xff] %v576_v59 }
  0x81   : > { %v580_v61 = vpop.eup %579  ;;  %337 = vst [vmem:[%s914_s19 + $0x68] sm:$0xff] %v578_v60 }
  0x82   : > { %v582_v62 = vpop.eup %581  ;;  %338 = vst [vmem:[%s914_s19 + $0x70] sm:$0xff] %v580_v61 }
  0x83   : > { %339 = vst [vmem:[%s914_s19 + $0x78] sm:$0xff] %v582_v62 }
  0x84   : > { %654 = shalt.err (!%p651_p5)
}
  0x85   : > { %s655_s29 = scalar_lea.hbm %s934_s7, 2048  ;;  %s659_s8 = scalar_lea.hbm %s990_s2, 4096 }
  0x86   : > { %p656_p9 = scmp.ne.s32.totalorder %s934_s7, %s655_s29  ;;  %p660_p7 = scmp.lt.u32.totalorder %s934_s7, %s990_s2 }
  0x87   : > { %p661_p3 = scmp.lt.u32.totalorder %s659_s8, %s655_s29  ;;  %p663_p13 = scmp.lt.u32.totalorder %s655_s29, %s934_s7 }
  0x88   : > { %p657_p1 = pnand %p656_p9, %p848_p10 }
  0x89   : > { %p662_p4 = por %p661_p3, %p660_p7 }
  0x8a   : > { %p658_p2 = pneg %p657_p1 }
  0x8b   : > { %p664_p6 = por %p663_p13, %p662_p4 }
  0x8d   : > { %p665_p8 = pnand %p664_p6, %p658_p2 }
  0x8f   : > { %668 = shalt.err (!%p665_p8)
}
  0x90   : > { %s735_s17 = smov 128   ;;  %s736_s19 = smov 8  }
  0x91   : > { %478 = dma.vmem_to_hbm [thread:$0]  (%p848_p10), %s936_s4, 2048, %s934_s7, %s341_s12, %s735_s17, %s735_s17, %s736_s19  }
  0x92 PF: > { %s372_s21 = sand.u32 1, %s707_s9   ;;  %p1008_p12 = scmp.ne.s32.totalorder %s998_s20, 0 }
  0x93   : > { %p1009_p11 = scmp.ge.s32.totalorder %s727_s14, 2  ;;  %s373_s5 = scalar_lea.sflag [#allocation4], %s372_s21 }
  0x95   : > { %p489_p0 = pnand %p1009_p11, %p1008_p12 }
  0x97   : > { %702 = dma.done.wait (!%p489_p0), %s373_s5, 2048  }
  0x98   : > { %704 = vsyncadd (!%p489_p0), %s373_s5, 4294965248  ;;  %s19_s14 = sadd.s32 1, %s727_s14   ;;  %s1010_s9 = smov %s711_s10 }
  0x99   : > { %p16_p5 = scmp.ge.s32.totalorder %s19_s14, 4   ;;  %s1011_s10 = smov %s715_s11 }
  0x9a   : > { %s1012_s11 = smov %s857_s28  ;;  %s1013_s12 = smov %s723_s13 }
  0x9b   : > { %s1014_s13 = smov %s1016_s25  ;;  %18 = sbr.rel (!%p16_p5) target bundleno = 7 (0x7), region = 78 }
  0xa2   :  { %378 = vsyncpa [#allocation3], 1 }
  0xa3   :  { %380 = vsyncpa [#allocation3 + $0x1], 1 }
  0xa4   :  { %381 = vsyncpa [#allocation6], 1 }
  0xa5   :  { %382 = vsyncpa [#allocation4], 1 }
  0xa6   :  { %384 = vsyncpa [#allocation4 + $0x1], 1 }

</bundles_post_ra>
